<compile_context>
chip_gen: v6e
topology: v6e:2x2x1
jax: 0.10.0
libtpu: 0.0.40
codegen_flags: <defaults>
</compile_context>

<pallas_src>
import jax
import jax.numpy as jnp
import numpy as np
from jax.experimental import pallas as pl
from jax.experimental.pallas import tpu as pltpu

BN_EPS = 1e-5
VAR_CLAMP = 1e-5


def _asp_kernel(x_ref, w1_ref, b1_ref, w2_ref, b2_ref, mu_ref, sg_ref):
  # x_ref  : (Bb, T, D)  batch block; time on sublanes, features on lanes
  # w1_ref : (D, H)      Conv1d(D->H, k=1) weights, transposed to input-major
  # b1_ref : (1, H)      Conv1d bias
  # w2_ref : (H, D)      Conv1d(H->D, k=1) weights, transposed, BN scale folded in
  # b2_ref : (1, D)      Conv1d bias with BN shift folded in
  # mu_ref : (Bb, D)     attentive mean
  # sg_ref : (Bb, D)     attentive std
  Bb, T, D = x_ref.shape

  x = x_ref[...]                                                      # (Bb, T, D)
  x2 = x.reshape(Bb * T, D)                                           # one big MXU slab

  # ---- attention MLP: two full-K MXU matmuls over all Bb*T timesteps ----
  h = jnp.dot(x2, w1_ref[...], preferred_element_type=jnp.float32) + b1_ref[...]
  h = jnp.maximum(h, 0.0)                                             # ReLU (BN folded into w2/b2)
  logits = (jnp.dot(h, w2_ref[...], preferred_element_type=jnp.float32)
            + b2_ref[...]).reshape(Bb, T, D)                          # (Bb, T, D)

  # ---- softmax over time (axis=1), normalization deferred ----
  m = jnp.max(logits, axis=1, keepdims=True)                          # (Bb, 1, D)
  e = jnp.exp(logits - m)                                             # unnormalized weights
  inv_l = pl.reciprocal(jnp.sum(e, axis=1), approx=False)             # (Bb, D), exact

  # ---- attentive statistics (2 full-(T,D) multiplies instead of 4) ----
  xe = x * e                                                          # (Bb, T, D)
  mu = jnp.sum(xe, axis=1) * inv_l                                    # (Bb, D)
  ex2 = jnp.sum(x * xe, axis=1) * inv_l                               # (Bb, D)
  sg = jnp.sqrt(jnp.maximum(ex2 - mu * mu, VAR_CLAMP))                # (Bb, D)

  mu_ref[...] = mu
  sg_ref[...] = sg


def _pick_batch_block(B, T, D, H, budget_bytes=20 * 1024 * 1024):
  """Largest divisor of B whose double-buffered working set fits the budget."""
  weight_bytes = 2 * (D * H + H * D + H + D) * 4          # weights, double-buffered
  per_elem = (2 * T * D + 4 * T * max(D, H) + 4 * D) * 4  # x (2-buf) + intermediates + out
  bb = max(1, min(B, (budget_bytes - weight_bytes) // max(per_elem, 1)))
  while B % bb:                                            # exact grid, no remainder step
    bb -= 1
  return int(bb)


@jax.jit
def asp_forward(x, w1, b1, gamma, beta, rmean, rvar, w2, b2):
  """x: (B, ..., T) float32.  Returns (B, 2*D) = cat([mu, sg], dim=1)."""
  B, T = x.shape[0], x.shape[-1]
  x_bdt = x.reshape(B, -1, T)                  # (B, D, T), as in the module
  D = x_bdt.shape[1]
  H = w1.shape[0]                              # 128 hidden attention channels

  # lane-dense layout: features D on the lane axis, time on sublanes
  # TODO(synk): have the upstream encoder emit (B, T, D) directly so this extra
  # host-side HBM pass over x disappears for large T (layout plumbing only).
  x_btd = jnp.transpose(x_bdt, (0, 2, 1))      # (B, T, D)

  # fold BatchNorm1d (running statistics, eval semantics) into the SECOND conv
  s1 = gamma * jax.lax.rsqrt(rvar + BN_EPS)    # (H,)
  t1 = beta - rmean * s1                       # (H,)
  w2t = jnp.transpose(w2) * s1[:, None]        # (H, D)
  b2f = t1 @ jnp.transpose(w2) + b2            # (D,)

  Bb = _pick_batch_block(B, T, D, H)
  grid = (B // Bb,)                            # v7x note: even step counts balance the 2 TCs

  mu, sg = pl.pallas_call(
      _asp_kernel,
      out_shape=(jax.ShapeDtypeStruct((B, D), jnp.float32),
                 jax.ShapeDtypeStruct((B, D), jnp.float32)),
      grid_spec=pltpu.PrefetchScalarGridSpec(
          num_scalar_prefetch=0,
          grid=grid,
          in_specs=[
              pl.BlockSpec((Bb, T, D), lambda b: (b, 0, 0)),   # x batch block
              pl.BlockSpec((D, H), lambda b: (0, 0)),          # w1^T
              pl.BlockSpec((1, H), lambda b: (0, 0)),          # b1
              pl.BlockSpec((H, D), lambda b: (0, 0)),          # w2^T (BN-folded)
              pl.BlockSpec((1, D), lambda b: (0, 0)),          # b2  (BN-folded)
          ],
          out_specs=[
              pl.BlockSpec((Bb, D), lambda b: (b, 0)),         # mu
              pl.BlockSpec((Bb, D), lambda b: (b, 0)),         # sg
          ],
      ),
      compiler_params=pltpu.CompilerParams(
          dimension_semantics=("parallel",),                   # megacore split on v7x
          vmem_limit_bytes=32 * 1024 * 1024,                   # raise v5e's 16 MiB default
      ),
  )(x_btd, jnp.transpose(w1), b1.reshape(1, H), w2t, b2f.reshape(1, D))

  return jnp.concatenate([mu, sg], axis=1)     # (B, 2D): [mu | sg]


# ---------------------------------------------------------------------------
# Pure-JAX reference (mirrors the PyTorch forward) for correctness checking.
# ---------------------------------------------------------------------------
def reference_forward(x, w1, b1, gamma, beta, rmean, rvar, w2, b2):
  B, T = x.shape[0], x.shape[-1]
  xr = x.reshape(B, -1, T)                                            # (B, D, T)
  h = jnp.einsum('od,bdt->bot', w1, xr) + b1[None, :, None]           # Conv1d k=1
  h = jnp.maximum(h, 0.0)                                             # ReLU
  h = ((h - rmean[None, :, None]) / jnp.sqrt(rvar[None, :, None] + BN_EPS)
       * gamma[None, :, None] + beta[None, :, None])                  # BatchNorm1d
  logits = jnp.einsum('do,bot->bdt', w2, h) + b2[None, :, None]       # Conv1d k=1
  w = jax.nn.softmax(logits, axis=2)                                  # softmax over T
  mu = jnp.sum(xr * w, axis=2)
  sg = jnp.sqrt(jnp.clip(jnp.sum(xr * xr * w, axis=2) - mu * mu, VAR_CLAMP, None))
  return jnp.concatenate([mu, sg], axis=1)                            # (B, 2D)


if __name__ == "__main__":
  B = 2
  IN_PLANES = 4
  ACOUSTIC_DIM = 32
  T = 8
  OUTMAP = ACOUSTIC_DIM // 8                   # 4
  D = IN_PLANES * 8 * OUTMAP                   # 128 (lane-dense feature dim)
  H = 128                                      # fixed by the module (Conv1d -> 128)

  key = jax.random.PRNGKey(0)
  ks = jax.random.split(key, 9)

  # feature map from the preceding encoder: (B, in_planes*8, outmap_size, T)
  x = jax.random.normal(ks[0], (B, IN_PLANES * 8, OUTMAP, T), jnp.float32)

  w1 = 0.2 * jax.random.normal(ks[1], (H, D), jnp.float32)   # Conv1d(D,128,k=1).weight
  b1 = 0.1 * jax.random.normal(ks[2], (H,), jnp.float32)
  gamma = 1.0 + 0.1 * jax.random.normal(ks[3], (H,), jnp.float32)
  beta = 0.1 * jax.random.normal(ks[4], (H,), jnp.float32)
  rmean = 0.1 * jax.random.normal(ks[5], (H,), jnp.float32)
  rvar = jnp.abs(1.0 + 0.1 * jax.random.normal(ks[6], (H,), jnp.float32))
  w2 = 0.2 * jax.random.normal(ks[7], (D, H), jnp.float32)   # Conv1d(128,D,k=1).weight
  b2 = 0.1 * jax.random.normal(ks[8], (D,), jnp.float32)

  out = asp_forward(x, w1, b1, gamma, beta, rmean, rvar, w2, b2)
  out = jax.block_until_ready(out)

  ref = reference_forward(x, w1, b1, gamma, beta, rmean, rvar, w2, b2)
  ref = jax.block_until_ready(ref)

  assert out.shape == (B, 2 * D)
  np.testing.assert_allclose(np.asarray(out), np.asarray(ref),
                             rtol=1e-4, atol=1e-4)
  print("KERNEL_OK")
</pallas_src>

<mosaic_0001>
module attributes {stable_mosaic.version = 11 : i64} {
  func.func @_asp_kernel(%arg0: i32, %arg1: memref<2x8x128xf32, #tpu.memory_space<vmem>>, %arg2: memref<128x128xf32, #tpu.memory_space<vmem>>, %arg3: memref<1x128xf32, #tpu.memory_space<vmem>>, %arg4: memref<128x128xf32, #tpu.memory_space<vmem>>, %arg5: memref<1x128xf32, #tpu.memory_space<vmem>>, %arg6: memref<2x128xf32, #tpu.memory_space<vmem>>, %arg7: memref<2x128xf32, #tpu.memory_space<vmem>>) attributes {dimension_semantics = [#tpu.dimension_semantics<parallel>], iteration_bounds = array<i64: 1>, scalar_prefetch = 0 : i64, scratch_operands = 0 : i64, tpu.core_type = #tpu.core_type<tc>, window_params = [{transform_indices = @transform_0, window_bounds = array<i64: 2, 8, 128>}, {pipeline_mode = #tpu.pipeline_mode<synchronous>, transform_indices = @transform_1, window_bounds = array<i64: 128, 128>}, {pipeline_mode = #tpu.pipeline_mode<synchronous>, transform_indices = @transform_2, window_bounds = array<i64: 1, 128>}, {pipeline_mode = #tpu.pipeline_mode<synchronous>, transform_indices = @transform_3, window_bounds = array<i64: 128, 128>}, {pipeline_mode = #tpu.pipeline_mode<synchronous>, transform_indices = @transform_4, window_bounds = array<i64: 1, 128>}, {transform_indices = @transform_5, window_bounds = array<i64: 2, 128>}, {transform_indices = @transform_6, window_bounds = array<i64: 2, 128>}]} {
    %c0 = arith.constant 0 : index
    %c0_0 = arith.constant 0 : index
    %c0_1 = arith.constant 0 : index
    %0 = vector.load %arg1[%c0, %c0_0, %c0_1] : memref<2x8x128xf32, #tpu.memory_space<vmem>>, vector<2x8x128xf32>
    %1 = vector.shape_cast %0 : vector<2x8x128xf32> to vector<16x128xf32>
    %c0_2 = arith.constant 0 : index
    %c0_3 = arith.constant 0 : index
    %2 = vector.load %arg2[%c0_2, %c0_3] : memref<128x128xf32, #tpu.memory_space<vmem>>, vector<128x128xf32>
    %cst = arith.constant dense<0.000000e+00> : vector<16x128xf32>
    %3 = tpu.matmul %1, %2, %cst {dimension_numbers = #tpu.dot_dimension_numbers<[1], [0], [0], [1], [0, 0, 1, 1], [], []>} : vector<16x128xf32>, vector<128x128xf32>, vector<16x128xf32> -> vector<16x128xf32>
    %c0_4 = arith.constant 0 : index
    %c0_5 = arith.constant 0 : index
    %4 = vector.load %arg3[%c0_4, %c0_5] : memref<1x128xf32, #tpu.memory_space<vmem>>, vector<1x128xf32>
    %5 = vector.broadcast %4 : vector<1x128xf32> to vector<16x128xf32>
    %6 = arith.addf %3, %5 : vector<16x128xf32>
    %cst_6 = arith.constant 0.000000e+00 : f32
    %7 = vector.broadcast %cst_6 : f32 to vector<16x128xf32>
    %8 = arith.maximumf %6, %7 : vector<16x128xf32>
    %c0_7 = arith.constant 0 : index
    %c0_8 = arith.constant 0 : index
    %9 = vector.load %arg4[%c0_7, %c0_8] : memref<128x128xf32, #tpu.memory_space<vmem>>, vector<128x128xf32>
    %cst_9 = arith.constant dense<0.000000e+00> : vector<16x128xf32>
    %10 = tpu.matmul %8, %9, %cst_9 {dimension_numbers = #tpu.dot_dimension_numbers<[1], [0], [0], [1], [0, 0, 1, 1], [], []>} : vector<16x128xf32>, vector<128x128xf32>, vector<16x128xf32> -> vector<16x128xf32>
    %c0_10 = arith.constant 0 : index
    %c0_11 = arith.constant 0 : index
    %11 = vector.load %arg5[%c0_10, %c0_11] : memref<1x128xf32, #tpu.memory_space<vmem>>, vector<1x128xf32>
    %12 = vector.broadcast %11 : vector<1x128xf32> to vector<16x128xf32>
    %13 = arith.addf %10, %12 : vector<16x128xf32>
    %14 = vector.shape_cast %13 : vector<16x128xf32> to vector<2x8x128xf32>
    %cst_12 = arith.constant dense<0xFF800000> : vector<2x128xf32>
    %15 = vector.multi_reduction <maximumf>, %14, %cst_12 [1] : vector<2x8x128xf32> to vector<2x128xf32>
    %16 = vector.shape_cast %15 : vector<2x128xf32> to vector<2x1x128xf32>
    %17 = vector.broadcast %16 : vector<2x1x128xf32> to vector<2x8x128xf32>
    %18 = arith.subf %14, %17 : vector<2x8x128xf32>
    %19 = math.exp %18 : vector<2x8x128xf32>
    %cst_13 = arith.constant dense<0.000000e+00> : vector<2x128xf32>
    %20 = vector.multi_reduction <add>, %19, %cst_13 [1] : vector<2x8x128xf32> to vector<2x128xf32>
    %21 = tpu.reciprocal %20 : vector<2x128xf32> -> vector<2x128xf32>
    %22 = arith.mulf %0, %19 : vector<2x8x128xf32>
    %cst_14 = arith.constant dense<0.000000e+00> : vector<2x128xf32>
    %23 = vector.multi_reduction <add>, %22, %cst_14 [1] : vector<2x8x128xf32> to vector<2x128xf32>
    %24 = arith.mulf %23, %21 : vector<2x128xf32>
    %25 = arith.mulf %0, %22 : vector<2x8x128xf32>
    %cst_15 = arith.constant dense<0.000000e+00> : vector<2x128xf32>
    %26 = vector.multi_reduction <add>, %25, %cst_15 [1] : vector<2x8x128xf32> to vector<2x128xf32>
    %27 = arith.mulf %26, %21 : vector<2x128xf32>
    %28 = arith.mulf %24, %24 : vector<2x128xf32>
    %29 = arith.subf %27, %28 : vector<2x128xf32>
    %cst_16 = arith.constant 9.99999974E-6 : f32
    %30 = vector.broadcast %cst_16 : f32 to vector<2x128xf32>
    %31 = arith.maximumf %29, %30 : vector<2x128xf32>
    %32 = math.sqrt %31 : vector<2x128xf32>
    %c0_17 = arith.constant 0 : index
    %c0_18 = arith.constant 0 : index
    %33 = vector.load %arg6[%c0_17, %c0_18] : memref<2x128xf32, #tpu.memory_space<vmem>>, vector<2x128xf32>
    tpu.vector_store %arg6[%c0_17, %c0_18], %24 {strides = array<i32>} : memref<2x128xf32, #tpu.memory_space<vmem>>, vector<2x128xf32>,
    %c0_19 = arith.constant 0 : index
    %c0_20 = arith.constant 0 : index
    %34 = vector.load %arg7[%c0_19, %c0_20] : memref<2x128xf32, #tpu.memory_space<vmem>>, vector<2x128xf32>
    tpu.vector_store %arg7[%c0_19, %c0_20], %32 {strides = array<i32>} : memref<2x128xf32, #tpu.memory_space<vmem>>, vector<2x128xf32>,
    return
  }
  func.func @transform_0(%arg0: i32) -> (i32, i32, i32) {
    %c0_i32 = arith.constant 0 : i32
    %c0_i32_0 = arith.constant 0 : i32
    %c0_i32_1 = arith.constant 0 : i32
    return %arg0, %c0_i32, %c0_i32_0 : i32, i32, i32
  }
  func.func @transform_1(%arg0: i32) -> (i32, i32) {
    %c0_i32 = arith.constant 0 : i32
    %c0_i32_0 = arith.constant 0 : i32
    %c0_i32_1 = arith.constant 0 : i32
    return %c0_i32, %c0_i32_0 : i32, i32
  }
  func.func @transform_2(%arg0: i32) -> (i32, i32) {
    %c0_i32 = arith.constant 0 : i32
    %c0_i32_0 = arith.constant 0 : i32
    %c0_i32_1 = arith.constant 0 : i32
    return %c0_i32, %c0_i32_0 : i32, i32
  }
  func.func @transform_3(%arg0: i32) -> (i32, i32) {
    %c0_i32 = arith.constant 0 : i32
    %c0_i32_0 = arith.constant 0 : i32
    %c0_i32_1 = arith.constant 0 : i32
    return %c0_i32, %c0_i32_0 : i32, i32
  }
  func.func @transform_4(%arg0: i32) -> (i32, i32) {
    %c0_i32 = arith.constant 0 : i32
    %c0_i32_0 = arith.constant 0 : i32
    %c0_i32_1 = arith.constant 0 : i32
    return %c0_i32, %c0_i32_0 : i32, i32
  }
  func.func @transform_5(%arg0: i32) -> (i32, i32) {
    %c0_i32 = arith.constant 0 : i32
    %c0_i32_0 = arith.constant 0 : i32
    return %arg0, %c0_i32 : i32, i32
  }
  func.func @transform_6(%arg0: i32) -> (i32, i32) {
    %c0_i32 = arith.constant 0 : i32
    %c0_i32_0 = arith.constant 0 : i32
    return %arg0, %c0_i32 : i32, i32
  }
}

</mosaic_0001>

<bundles_post_ra>
// kernel: asp_forward.1
= control target key start
LH: loop header
LB: loop body
LE: loop exit
PB: predicated region body
PF: predicated region fallthrough
CT: control target
= control target key end

     0   :  { %vm308_vm0 = vcmask 1041409   ;;  %s601_s1 = inlined_call_operand.vmem [shape: f32[128,128], index: 1, kind: input, shape index: {}]   ;;  %s602_s0 = inlined_call_operand.vmem [shape: f32[2,8,128], index: 0, kind: input, shape index: {}]   ;;  %s603_s3 = inlined_call_operand.vmem [shape: f32[128,128], index: 3, kind: input, shape index: {}]   ;;  %s604_s2 = inlined_call_operand.vmem [shape: f32[1,128], index: 2, kind: input, shape index: {}]   ;;  %s605_s4 = inlined_call_operand.vmem [shape: f32[1,128], index: 4, kind: input, shape index: {}]   ;;  %s606_s5 = inlined_call_operand.vmem [shape: f32[2,128], index: 5, kind: output, shape index: {0}]   ;;  %s607_s6 = inlined_call_operand.vmem [shape: f32[2,128], index: 6, kind: output, shape index: {1}]  }
   0x1   :  { %v39_v0 = vld [vmem:[%s601_s1 + $0x78] sm:$0xff]  ;;  %v38_v1 = vld [vmem:[%s601_s1 + $0x70] sm:$0xff]  ;;  %v37_v2 = vld [vmem:[%s601_s1 + $0x68] sm:$0xff] }
   0x2   :  { %363 = vmatprep.subr.mxu0 %v39_v0  ;;  %v36_v3 = vld [vmem:[%s601_s1 + $0x60] sm:$0xff]  ;;  %v35_v5 = vld [vmem:[%s601_s1 + $0x58] sm:$0xff]  ;;  %v138_v7 = vld [vmem:[%s603_s3 + $0x70] sm:$0xff] }
   0x3   :  { %364 = vmatpush3.msra.mxu0 %v39_v0  ;;  %v495_v4 = vld [vmem:[%s602_s0] sm:$0xff]  ;;  %v139_v6 = vld [vmem:[%s603_s3 + $0x78] sm:$0xff]  ;;  %v34_v8 = vld [vmem:[%s601_s1 + $0x50] sm:$0xff] }
   0x4   :  { %365 = vmatprep.subr.mxu0 %v38_v1  ;;  %395 = vmatprep.mubr.f32.mxu0 %v495_v4  ;;  %v137_v9 = vld [vmem:[%s603_s3 + $0x68] sm:$0xff]  ;;  %v136_v11 = vld [vmem:[%s603_s3 + $0x60] sm:$0xff]  ;;  %v135_v13 = vld [vmem:[%s603_s3 + $0x58] sm:$0xff] }
   0x5   :  { %366 = vmatpush3.msra.mxu0 %v38_v1  ;;  %398 = vmatprep.subr.mxu1 %v139_v6  ;;  %v33_v10 = vld [vmem:[%s601_s1 + $0x48] sm:$0xff]  ;;  %v32_v12 = vld [vmem:[%s601_s1 + $0x40] sm:$0xff]  ;;  %v31_v14 = vld [vmem:[%s601_s1 + $0x38] sm:$0xff] }
   0x6   :  { %367 = vmatprep.subr.mxu0 %v37_v2  ;;  %399 = vmatpush3.msra.mxu1 %v139_v6  ;;  %v134_v15 = vld [vmem:[%s603_s3 + $0x50] sm:$0xff]  ;;  %v133_v17 = vld [vmem:[%s603_s3 + $0x48] sm:$0xff]  ;;  %v132_v19 = vld [vmem:[%s603_s3 + $0x40] sm:$0xff] }
   0x7   :  { %368 = vmatpush3.msra.mxu0 %v37_v2  ;;  %400 = vmatprep.subr.mxu1 %v138_v7  ;;  %v30_v16 = vld [vmem:[%s601_s1 + $0x30] sm:$0xff]  ;;  %v29_v18 = vld [vmem:[%s601_s1 + $0x28] sm:$0xff]  ;;  %v28_v20 = vld [vmem:[%s601_s1 + $0x20] sm:$0xff] }
   0x8   :  { %369 = vmatprep.subr.mxu0 %v36_v3  ;;  %401 = vmatpush3.msra.mxu1 %v138_v7  ;;  %v131_v21 = vld [vmem:[%s603_s3 + $0x38] sm:$0xff]  ;;  %v130_v23 = vld [vmem:[%s603_s3 + $0x30] sm:$0xff]  ;;  %v129_v25 = vld [vmem:[%s603_s3 + $0x28] sm:$0xff] }
   0x9   :  { %370 = vmatpush3.msra.mxu0 %v36_v3  ;;  %402 = vmatprep.subr.mxu1 %v137_v9  ;;  %v27_v22 = vld [vmem:[%s601_s1 + $0x18] sm:$0xff]  ;;  %v26_v24 = vld [vmem:[%s601_s1 + $0x10] sm:$0xff]  ;;  %v25_v26 = vld [vmem:[%s601_s1 + $0x8] sm:$0xff] }
   0xa   :  { %371 = vmatprep.subr.mxu0 %v35_v5  ;;  %403 = vmatpush3.msra.mxu1 %v137_v9  ;;  %v128_v27 = vld [vmem:[%s603_s3 + $0x20] sm:$0xff]  ;;  %v23_v29 = vld [vmem:[%s602_s0 + $0x8] sm:$0xff]  ;;  %v127_v30 = vld [vmem:[%s603_s3 + $0x18] sm:$0xff] }
   0xb   :  { %372 = vmatpush3.msra.mxu0 %v35_v5  ;;  %404 = vmatprep.subr.mxu1 %v136_v11  ;;  %v24_v28 = vld [vmem:[%s601_s1] sm:$0xff]  ;;  %v126_v31 = vld [vmem:[%s603_s3 + $0x10] sm:$0xff]  ;;  %v125_v32 = vld [vmem:[%s603_s3 + $0x8] sm:$0xff] }
   0xc   :  { %373 = vmatprep.subr.mxu0 %v34_v8  ;;  %405 = vmatpush3.msra.mxu1 %v136_v11  ;;  %v124_v33 = vld [vmem:[%s603_s3] sm:$0xff] }
   0xd   :  { %374 = vmatpush3.msra.mxu0 %v34_v8  ;;  %406 = vmatprep.subr.mxu1 %v135_v13  ;;  %v325_v34 = vld [vmem:[%s604_s2] ss:$0 sm:$0xff] }
   0xe   :  { %375 = vmatprep.subr.mxu0 %v33_v10  ;;  %407 = vmatpush3.msra.mxu1 %v135_v13  ;;  %v326_v41 = vld [vmem:[%s605_s4] ss:$0 sm:$0xff] }
   0xf   :  { %376 = vmatpush3.msra.mxu0 %v33_v10  ;;  %408 = vmatprep.subr.mxu1 %v134_v15 }
  0x10   :  { %377 = vmatprep.subr.mxu0 %v32_v12  ;;  %409 = vmatpush3.msra.mxu1 %v134_v15 }
  0x11   :  { %378 = vmatpush3.msra.mxu0 %v32_v12  ;;  %410 = vmatprep.subr.mxu1 %v133_v17 }
  0x12   :  { %379 = vmatprep.subr.mxu0 %v31_v14  ;;  %411 = vmatpush3.msra.mxu1 %v133_v17 }
  0x13   :  { %380 = vmatpush3.msra.mxu0 %v31_v14  ;;  %412 = vmatprep.subr.mxu1 %v132_v19 }
  0x14   :  { %381 = vmatprep.subr.mxu0 %v30_v16  ;;  %413 = vmatpush3.msra.mxu1 %v132_v19 }
  0x15   :  { %382 = vmatpush3.msra.mxu0 %v30_v16  ;;  %414 = vmatprep.subr.mxu1 %v131_v21 }
  0x16   :  { %383 = vmatprep.subr.mxu0 %v29_v18  ;;  %415 = vmatpush3.msra.mxu1 %v131_v21 }
  0x17   :  { %384 = vmatpush3.msra.mxu0 %v29_v18  ;;  %416 = vmatprep.subr.mxu1 %v130_v23 }
  0x18   :  { %385 = vmatprep.subr.mxu0 %v28_v20  ;;  %417 = vmatpush3.msra.mxu1 %v130_v23 }
  0x19   :  { %386 = vmatpush3.msra.mxu0 %v28_v20  ;;  %418 = vmatprep.subr.mxu1 %v129_v25 }
  0x1a   :  { %387 = vmatprep.subr.mxu0 %v27_v22  ;;  %419 = vmatpush3.msra.mxu1 %v129_v25 }
  0x1b   :  { %388 = vmatpush3.msra.mxu0 %v27_v22  ;;  %420 = vmatprep.subr.mxu1 %v128_v27 }
  0x1c   :  { %389 = vmatprep.subr.mxu0 %v26_v24  ;;  %421 = vmatpush3.msra.mxu1 %v128_v27 }
  0x1d   :  { %390 = vmatpush3.msra.mxu0 %v26_v24  ;;  %422 = vmatprep.subr.mxu1 %v127_v30 }
  0x1e   :  { %391 = vmatprep.subr.mxu0 %v25_v26  ;;  %423 = vmatpush3.msra.mxu1 %v127_v30 }
  0x1f   :  { %392 = vmatpush3.msra.mxu0 %v25_v26  ;;  %424 = vmatprep.subr.mxu1 %v126_v31 }
  0x20   :  { %393 = vmatprep.subr.mxu0 %v24_v28  ;;  %425 = vmatpush3.msra.mxu1 %v126_v31 }
  0x21   :  { %394 = vmatpush3.msra.mxu0 %v24_v28  ;;  %426 = vmatprep.subr.mxu1 %v125_v32 }
  0x22   :  { %396 = vmatmul.mubr.f32.vlgmr.msra.gmra.mxu0 %v23_v29  ;;  %427 = vmatpush3.msra.mxu1 %v125_v32 }
  0x23   :  { %428 = vmatprep.subr.mxu1 %v124_v33 }
  0x24   :  { %429 = vmatpush3.msra.mxu1 %v124_v33 }
  0xe2   :  { %v397_v35 = vpop.f32.mrf.mxu0 }
  0xe3   :  { %v119_v36 = vadd.f32 %v397_v35, %v325_v34 }
  0xe4   :  { %v113_v37 = vpop.f32.mrf.mxu0 }
  0xe5   :  { %v114_v38 = vadd.f32 %v325_v34, %v113_v37  ;;  %v123_v40 = vmax.f32 %v119_v36, 0.0 }
  0xe7   :  { %v122_v39 = vmax.f32 %v114_v38, 0.0 }
  0xe9   :  { %430 = vmatprep.mubr.f32.mxu1 %v122_v39 }
  0xea   :  { %431 = vmatmul.mubr.f32.vlgmr.msra.gmra.mxu1 %v123_v40 }
 0x1aa   :  { %v432_v42 = vpop.f32.mrf.mxu1 }
 0x1ab   :  { %v219_v43 = vadd.f32 %v432_v42, %v326_v41 }
 0x1ac   :  { %v213_v44 = vpop.f32.mrf.mxu1 }
 0x1ad   :  { %v228_v45 = vrot.slane %v219_v43, 4  ;;  %v214_v46 = vadd.f32 %v326_v41, %v213_v44 }
 0x1af   :  { %v229_v47 = vmax.f32 %v219_v43, %v228_v45  ;;  %v222_v48 = vrot.slane %v214_v46, 4 }
 0x1b1   :  { %v230_v49 = vrot.slane %v229_v47, 2  ;;  %v223_v50 = vmax.f32 %v214_v46, %v222_v48 }
 0x1b3   :  { %v231_v51 = vmax.f32 %v229_v47, %v230_v49  ;;  %v224_v52 = vrot.slane %v223_v50, 2 }
 0x1b5   :  { %v232_v53 = vrot.slane %v231_v51, 1  ;;  %v225_v54 = vmax.f32 %v223_v50, %v224_v52 }
 0x1b7   :  { %v233_v55 = vmax.f32 %v231_v51, %v232_v53  ;;  %v226_v56 = vrot.slane %v225_v54, 1 }
 0x1b9   :  { %v235_v57 = vsub.f32 %v219_v43, %v233_v55  ;;  %v227_v58 = vmax.f32 %v225_v54, %v226_v56 }
 0x1bb   :  { %v238_v59 = vmul.f32 1.442695, %v235_v57  ;;  %v234_v60 = vsub.f32 %v214_v46, %v227_v58 }
 0x1bd   :  { %433 = vpow2.f32 %v238_v59  ;;  %v236_v61 = vmul.f32 1.442695, %v234_v60 }
 0x1bf   :  { %435 = vpow2.f32 %v236_v61 }
 0x1ca   :  { %v434_v62 = vpop.eup %433 }
 0x1cb   :  { %v246_v63 = vrot.slane %v434_v62, 4  ;;  %v255_v0 = vmul.f32 %v434_v62, %v23_v29 }
 0x1cc   :  { %v436_v1 = vpop.eup %435 }
 0x1cd   :  { %v247_v2 = vadd.f32 %v434_v62, %v246_v63  ;;  %v271_v3 = vmul.f32 %v255_v0, %v23_v29  ;;  %v240_v5 = vrot.slane %v436_v1, 4  ;;  %v254_v6 = vmul.f32 %v436_v1, %v495_v4 }
 0x1ce   :  { %v262_v8 = vrot.slane %v255_v0, 4 }
 0x1cf   :  { %v248_v7 = vrot.slane %v247_v2, 2  ;;  %v241_v9 = vadd.f32 %v436_v1, %v240_v5  ;;  %v270_v10 = vmul.f32 %v254_v6, %v495_v4  ;;  %v278_v12 = vrot.slane %v271_v3, 4 }
 0x1d0   :  { %v256_v14 = vrot.slane %v254_v6, 4  ;;  %v263_v16 = vadd.f32 %v262_v8, %v255_v0 }
 0x1d1   :  { %v249_v11 = vadd.f32 %v248_v7, %v247_v2  ;;  %v242_v13 = vrot.slane %v241_v9, 2  ;;  %v272_v18 = vrot.slane %v270_v10, 4  ;;  %v279_v20 = vadd.f32 %v278_v12, %v271_v3 }
 0x1d2   :  { %v257_v22 = vadd.f32 %v256_v14, %v254_v6  ;;  %v264_v23 = vrot.slane %v263_v16, 2 }
 0x1d3   :  { %v250_v15 = vrot.slane %v249_v11, 1  ;;  %v243_v17 = vadd.f32 %v242_v13, %v241_v9  ;;  %v273_v25 = vadd.f32 %v272_v18, %v270_v10  ;;  %v280_v26 = vrot.slane %v279_v20, 2 }
 0x1d4   :  { %v258_v27 = vrot.slane %v257_v22, 2  ;;  %v265_v4 = vadd.f32 %v264_v23, %v263_v16 }
 0x1d5   :  { %v251_v19 = vadd.f32 %v250_v15, %v249_v11  ;;  %v244_v21 = vrot.slane %v243_v17, 1  ;;  %v274_v28 = vrot.slane %v273_v25, 2  ;;  %v281_v29 = vadd.f32 %v280_v26, %v279_v20 }
 0x1d6   :  { %v259_v30 = vadd.f32 %v258_v27, %v257_v22  ;;  %v266_v31 = vrot.slane %v265_v4, 1 }
 0x1d7   :  { %437 = vrcp.f32 %v251_v19  ;;  %v245_v24 = vadd.f32 %v244_v21, %v243_v17  ;;  %v275_v32 = vadd.f32 %v274_v28, %v273_v25  ;;  %v282_v33 = vrot.slane %v281_v29, 1 }
 0x1d8   :  { %v260_v34 = vrot.slane %v259_v30, 1  ;;  %v267_v35 = vadd.f32 %v266_v31, %v265_v4 }
 0x1d9   :  { %439 = vrcp.f32 %v245_v24  ;;  %v276_v36 = vrot.slane %v275_v32, 1  ;;  %v283_v39 = vadd.f32 %v282_v33, %v281_v29 }
 0x1da   :  { %v261_v40 = vadd.f32 %v260_v34, %v259_v30 }
 0x1db   :  { %v277_v45 = vadd.f32 %v276_v36, %v275_v32 }
 0x1e4   :  { %v438_v37 = vpop.eup %437 }
 0x1e5   :  { %v269_v38 = vmul.f32 %v438_v37, %v267_v35  ;;  %v285_v42 = vmul.f32 %v438_v37, %v283_v39 }
 0x1e6   :  { %v440_v41 = vpop.eup %439 }
 0x1e7   :  { %v287_v43 = vmul.f32 %v269_v38, %v269_v38  ;;  %v268_v44 = vmul.f32 %v440_v41, %v261_v40  ;;  %v284_v47 = vmul.f32 %v440_v41, %v277_v45 }
 0x1e9   :  { %v289_v46 = vsub.f32 %v285_v42, %v287_v43  ;;  %v286_v48 = vmul.f32 %v268_v44, %v268_v44  ;;  %v309_v49 = vsel %vm308_vm0, %v269_v38, %v268_v44 }
 0x1ea   :  { %311 = vst [vmem:[%s606_s5] sm:$0x3] %v309_v49 }
 0x1eb   :  { %v291_v50 = vmax.f32 %v289_v46, 1e-05  ;;  %v288_v51 = vsub.f32 %v284_v47, %v286_v48 }
 0x1ed   :  { %441 = vrsqrt.f32 %v291_v50  ;;  %v290_v52 = vmax.f32 %v288_v51, 1e-05  ;;  %vm301_vm1 = vcmp.eq.f32.partialorder %v291_v50, inf  ;;  %v304_v59 = vand.u32 2147483648, %v291_v50 }
 0x1ee   :  { %vm303_vm4 = vcmp.eq.f32.partialorder %v291_v50, 0.0 }
 0x1ef   :  { %443 = vrsqrt.f32 %v290_v52  ;;  %vm294_vm2 = vcmp.eq.f32.partialorder %v290_v52, inf  ;;  %v297_v58 = vand.u32 2147483648, %v290_v52  ;;  %vm296_vm3 = vcmp.eq.f32.partialorder %v290_v52, 0.0 }
 0x1fa   :  { %v442_v53 = vpop.eup %441 }
 0x1fb   :  { %v300_v54 = vmul.f32 %v442_v53, %v291_v50 }
 0x1fc   :  { %v444_v55 = vpop.eup %443 }
 0x1fd   :  { %v293_v56 = vmul.f32 %v444_v55, %v290_v52  ;;  %v302_v57 = vsel %vm301_vm1, %v291_v50, %v300_v54 }
 0x1fe   :  { %v305_v62 = vsel %vm303_vm4, %v304_v59, %v302_v57 }
 0x1ff   :  { %v295_v60 = vsel %vm294_vm2, %v290_v52, %v293_v56 }
 0x200   :  { %v298_v61 = vsel %vm296_vm3, %v297_v58, %v295_v60 }
 0x201   :  { %v314_v63 = vsel %vm308_vm0, %v305_v62, %v298_v61 }
 0x202   :  { %316 = vst [vmem:[%s607_s6] sm:$0x3] %v314_v63 }

</bundles_post_ra>
